<compile_context>
chip_gen: v7x
topology: tpu7x:2x2x1
jax: 0.10.0
libtpu: 0.0.40
codegen_flags: <defaults>
</compile_context>

<pallas_src>
import math

import jax
import jax.numpy as jnp
from jax.experimental import pallas as pl
from jax.experimental.pallas import tpu as pltpu


# -----------------------------------------------------------------------------
# Kernel
# -----------------------------------------------------------------------------
def _twin_q_kernel(s_ref, a_ref, w1_ref, w23_ref, b_ref, w4_ref, b4_ref, o_ref):
    """Fused twin-Q MLPs: (Linear+ReLU)*3 on the MXU + VPU/XLU head, one store."""
    f32, bf16 = jnp.float32, jnp.bfloat16

    # x = concat(state, action): 16 lanes, one cheap in-register lane
    # shift/select -> a single layer-1 MXU pass per net (no split K=12/K=4 dots).
    x = jnp.concatenate([s_ref[...], a_ref[...]], axis=-1).astype(bf16)

    w4_all = w4_ref[...]          # (2, H) f32 head weights (VPU path)
    b4 = b4_ref[...]              # (1, 2) f32 head biases

    def net(idx):                 # idx is a Python int -> fully static/unrolled
        b = b_ref[idx]            # (3, H) f32 biases for this net
        h = jnp.dot(x, w1_ref[idx], preferred_element_type=f32) + b[0:1]
        h = jnp.maximum(h, 0.0).astype(bf16)
        h = jnp.dot(h, w23_ref[idx, 0], preferred_element_type=f32) + b[1:2]
        h = jnp.maximum(h, 0.0).astype(bf16)
        h = jnp.dot(h, w23_ref[idx, 1], preferred_element_type=f32) + b[2:3]
        h = jnp.maximum(h, 0.0)
        # (H -> 1) head off the MXU: VPU multiply + XLU lane reduce.
        return jnp.sum(h * w4_all[idx:idx + 1], axis=-1, keepdims=True)

    q = jnp.concatenate([net(0), net(1)], axis=-1) + b4     # (TB, 2): q1 | q2
    o_ref[...] = q.astype(o_ref.dtype)


# -----------------------------------------------------------------------------
# Wrapper
# -----------------------------------------------------------------------------
def _round_up(x, m):
    return ((x + m - 1) // m) * m


def _pick_tile(batch):
    """Batch-tile rows.

    Small batches: one tile (rounded to the 8-row sublane granule).
    Larger batches: always an even number of tiles (>= 2) so the 'parallel'
    batch axis shards across v7x's two TensorCores, with tiles up to ~1024
    rows to amortize per-grid-step overhead on v5e/v6e (working set per tile
    is ~1-2 MiB, far below the scoped VMEM limit on every generation).
    """
    if batch <= 256:
        return _round_up(max(batch, 1), 8)
    n_tiles = max(2, -(-batch // 1024))
    if n_tiles % 2:
        n_tiles += 1
    return _round_up(-(-batch // n_tiles), 8)


@jax.jit
def twin_q_forward(state, action, params):
    """Returns (q1, q2), each (B, 1) float32."""
    B, s_dim = state.shape
    a_dim = action.shape[1]

    w1, w23, b, w4, b4 = (params["w1"], params["w23"], params["b"],
                          params["w4"], params["b4"])
    hidden = w1.shape[-1]

    tb = _pick_tile(B)
    n_tiles = pl.cdiv(B, tb)      # ragged last block handled by Pallas (no pad)

    def row_spec(feat):
        return pl.BlockSpec((tb, feat), lambda i: (i, 0))

    def const_spec(arr):
        # Full-array block, constant index map -> fetched once, VMEM-resident.
        return pl.BlockSpec(arr.shape, lambda i, _n=arr.ndim: (0,) * _n)

    flops = 2 * B * 2 * ((s_dim + a_dim) * hidden + 2 * hidden * hidden + hidden)
    bytes_accessed = (state.size * 4 + action.size * 4 + B * 2 * 4
                      + w1.size * 2 + w23.size * 2
                      + b.size * 4 + w4.size * 4 + b4.size * 4)

    out = pl.pallas_call(
        _twin_q_kernel,
        out_shape=jax.ShapeDtypeStruct((B, 2), jnp.float32),
        grid=(n_tiles,),
        in_specs=[row_spec(s_dim), row_spec(a_dim),
                  const_spec(w1), const_spec(w23), const_spec(b),
                  const_spec(w4), const_spec(b4)],
        out_specs=pl.BlockSpec((tb, 2), lambda i: (i, 0)),
        compiler_params=pltpu.CompilerParams(
            dimension_semantics=("parallel",)),
        cost_estimate=pl.CostEstimate(
            flops=int(flops), transcendentals=0,
            bytes_accessed=int(bytes_accessed)),
    )(state, action, w1, w23, b, w4, b4)

    return out[:, 0:1], out[:, 1:2]


# -----------------------------------------------------------------------------
# Parameter construction (PyTorch Linear-style init, kernel-friendly layout)
# -----------------------------------------------------------------------------
def init_double_q_params(key, state_dim, action_dim, hidden):
    """Both nets' params packed into 5 arrays (kernel layout).

    Matmul weights -> bf16 (MXU native, f32 accumulation); biases and the
    VPU head weights stay f32.  W1 stays a single (state+action, hidden) block
    (matches torch.cat((state, action), dim=1) @ W1).
    """
    in_dim = state_dim + action_dim

    def linear(k, fi, fo):
        kw, kb = jax.random.split(k)
        bound = 1.0 / math.sqrt(fi)
        w = jax.random.uniform(kw, (fi, fo), jnp.float32, -bound, bound)
        bb = jax.random.uniform(kb, (fo,), jnp.float32, -bound, bound)
        return w, bb

    keys = jax.random.split(key, 8)
    w1l, w23l, bl, w4l, b4l = [], [], [], [], []
    for n in range(2):
        k1, k2, k3, k4 = keys[4 * n:4 * n + 4]
        w1, b1 = linear(k1, in_dim, hidden)
        w2, b2 = linear(k2, hidden, hidden)
        w3, b3 = linear(k3, hidden, hidden)
        w4, b4 = linear(k4, hidden, 1)
        w1l.append(w1)
        w23l.append(jnp.stack([w2, w3]))
        bl.append(jnp.stack([b1, b2, b3]))
        w4l.append(w4[:, 0])
        b4l.append(b4)

    bf16 = jnp.bfloat16
    return dict(
        w1=jnp.stack(w1l).astype(bf16),      # (2, in_dim, H) bf16
        w23=jnp.stack(w23l).astype(bf16),    # (2, 2, H, H)   bf16
        b=jnp.stack(bl),                     # (2, 3, H)      f32
        w4=jnp.stack(w4l),                   # (2, H)         f32
        b4=jnp.concatenate(b4l)[None, :],    # (1, 2)         f32
    )


class DoubleQFuncPallas:
    """Twin Q-networks; forward returns (q1, q2), each of shape (B, 1)."""

    def __init__(self, state_dim, action_dim, hidden_size=256, seed=0):
        self.params = init_double_q_params(
            jax.random.PRNGKey(seed), state_dim, action_dim, hidden_size)

    def __call__(self, state, action):
        return twin_q_forward(state, action, self.params)


# -----------------------------------------------------------------------------
# References for correctness checks
# -----------------------------------------------------------------------------
def _ref_net_kernel_math(state, action, params, idx):
    """Pure-JAX replica of the kernel math (bf16 matmuls, f32 accum, f32 head)."""
    bf16, f32 = jnp.bfloat16, jnp.float32
    x = jnp.concatenate([state, action], axis=-1).astype(bf16)
    w1, w23, b = params["w1"][idx], params["w23"][idx], params["b"][idx]
    w4, b4 = params["w4"][idx], params["b4"][0, idx]
    h = jnp.dot(x, w1, preferred_element_type=f32) + b[0:1]
    h = jnp.maximum(h, 0.0).astype(bf16)
    h = jnp.dot(h, w23[0], preferred_element_type=f32) + b[1:2]
    h = jnp.maximum(h, 0.0).astype(bf16)
    h = jnp.dot(h, w23[1], preferred_element_type=f32) + b[2:3]
    h = jnp.maximum(h, 0.0)
    return jnp.sum(h * w4[None, :], axis=-1, keepdims=True) + b4


def _ref_net_f32(state, action, params, idx):
    """fp32 semantic reference (weights upcast from bf16) of the torch module."""
    x = jnp.concatenate([state, action], axis=-1)
    w1 = params["w1"][idx].astype(jnp.float32)
    w23 = params["w23"][idx].astype(jnp.float32)
    b = params["b"][idx]
    w4, b4 = params["w4"][idx], params["b4"][0, idx]
    h = jnp.maximum(x @ w1 + b[0:1], 0.0)
    h = jnp.maximum(h @ w23[0] + b[1:2], 0.0)
    h = jnp.maximum(h @ w23[1] + b[2:3], 0.0)
    return h @ w4[:, None] + b4


if __name__ == "__main__":
    STATE_DIM, ACTION_DIM, HIDDEN = 12, 4, 256   # module default hidden_size

    qfunc = DoubleQFuncPallas(STATE_DIM, ACTION_DIM, hidden_size=HIDDEN, seed=0)

    for B in (8, 20):   # 20 exercises the ragged (non-multiple-of-tile) path
        key = jax.random.PRNGKey(0)
        ks, ka = jax.random.split(key)
        state = jax.random.normal(ks, (B, STATE_DIM), jnp.float32)
        action = jax.random.normal(ka, (B, ACTION_DIM), jnp.float32)

        q1, q2 = qfunc(state, action)
        jax.block_until_ready((q1, q2))
        assert q1.shape == (B, 1) and q2.shape == (B, 1)

        # Exact-path check against a pure-JAX replica of the kernel math.
        q1_ref = _ref_net_kernel_math(state, action, qfunc.params, 0)
        q2_ref = _ref_net_kernel_math(state, action, qfunc.params, 1)
        assert jnp.allclose(q1, q1_ref, atol=5e-3, rtol=5e-3)
        assert jnp.allclose(q2, q2_ref, atol=5e-3, rtol=5e-3)

        # Loose semantic check vs an fp32 reference (bf16 weight rounding only).
        q1_f32 = _ref_net_f32(state, action, qfunc.params, 0)
        q2_f32 = _ref_net_f32(state, action, qfunc.params, 1)
        assert jnp.allclose(q1, q1_f32, atol=5e-2, rtol=5e-2)
        assert jnp.allclose(q2, q2_f32, atol=5e-2, rtol=5e-2)

    print("KERNEL_OK")
</pallas_src>

<mosaic_0001>
module attributes {stable_mosaic.version = 11 : i64} {
  func.func @_twin_q_kernel(%arg0: i32, %arg1: memref<8x12xf32, #tpu.memory_space<vmem>>, %arg2: memref<8x4xf32, #tpu.memory_space<vmem>>, %arg3: memref<2x16x256xbf16, #tpu.memory_space<vmem>>, %arg4: memref<2x2x256x256xbf16, #tpu.memory_space<vmem>>, %arg5: memref<2x3x256xf32, #tpu.memory_space<vmem>>, %arg6: memref<2x256xf32, #tpu.memory_space<vmem>>, %arg7: memref<1x2xf32, #tpu.memory_space<vmem>>, %arg8: memref<8x2xf32, #tpu.memory_space<vmem>>) attributes {dimension_semantics = [#tpu.dimension_semantics<parallel>], iteration_bounds = array<i64: 1>, scalar_prefetch = 0 : i64, scratch_operands = 0 : i64, tpu.core_type = #tpu.core_type<tc>, window_params = [{transform_indices = @transform_0, window_bounds = array<i64: 8, 12>}, {transform_indices = @transform_1, window_bounds = array<i64: 8, 4>}, {pipeline_mode = #tpu.pipeline_mode<synchronous>, transform_indices = @transform_2, window_bounds = array<i64: 2, 16, 256>}, {pipeline_mode = #tpu.pipeline_mode<synchronous>, transform_indices = @transform_3, window_bounds = array<i64: 2, 2, 256, 256>}, {pipeline_mode = #tpu.pipeline_mode<synchronous>, transform_indices = @transform_4, window_bounds = array<i64: 2, 3, 256>}, {pipeline_mode = #tpu.pipeline_mode<synchronous>, transform_indices = @transform_5, window_bounds = array<i64: 2, 256>}, {pipeline_mode = #tpu.pipeline_mode<synchronous>, transform_indices = @transform_6, window_bounds = array<i64: 1, 2>}, {transform_indices = @transform_7, window_bounds = array<i64: 8, 2>}]} {
    %c0 = arith.constant 0 : index
    %c0_0 = arith.constant 0 : index
    %0 = vector.load %arg1[%c0, %c0_0] : memref<8x12xf32, #tpu.memory_space<vmem>>, vector<8x12xf32>
    %c0_1 = arith.constant 0 : index
    %c0_2 = arith.constant 0 : index
    %1 = vector.load %arg2[%c0_1, %c0_2] : memref<8x4xf32, #tpu.memory_space<vmem>>, vector<8x4xf32>
    %2 = tpu.concatenate %0, %1 in 1 : vector<8x12xf32>, vector<8x4xf32> -> vector<8x16xf32>
    %3 = arith.truncf %2 : vector<8x16xf32> to vector<8x16xbf16>
    %c0_3 = arith.constant 0 : index
    %c0_4 = arith.constant 0 : index
    %4 = vector.load %arg6[%c0_3, %c0_4] : memref<2x256xf32, #tpu.memory_space<vmem>>, vector<2x256xf32>
    %c0_5 = arith.constant 0 : index
    %c0_6 = arith.constant 0 : index
    %5 = vector.load %arg7[%c0_5, %c0_6] : memref<1x2xf32, #tpu.memory_space<vmem>>, vector<1x2xf32>
    %c0_7 = arith.constant 0 : index
    %c0_8 = arith.constant 0 : index
    %c0_9 = arith.constant 0 : index
    %6 = vector.load %arg5[%c0_7, %c0_8, %c0_9] : memref<2x3x256xf32, #tpu.memory_space<vmem>>, vector<1x3x256xf32>
    %7 = vector.shape_cast %6 : vector<1x3x256xf32> to vector<3x256xf32>
    %c0_10 = arith.constant 0 : index
    %c0_11 = arith.constant 0 : index
    %c0_12 = arith.constant 0 : index
    %8 = vector.load %arg3[%c0_10, %c0_11, %c0_12] : memref<2x16x256xbf16, #tpu.memory_space<vmem>>, vector<1x16x256xbf16>
    %9 = vector.shape_cast %8 : vector<1x16x256xbf16> to vector<16x256xbf16>
    %cst = arith.constant dense<0.000000e+00> : vector<8x256xf32>
    %10 = tpu.matmul %3, %9, %cst {dimension_numbers = #tpu.dot_dimension_numbers<[1], [0], [0], [1], [0, 0, 1, 1], [], []>} : vector<8x16xbf16>, vector<16x256xbf16>, vector<8x256xf32> -> vector<8x256xf32>
    %11 = vector.extract_strided_slice %7 {offsets = [0, 0], sizes = [1, 256], strides = [1, 1]} : vector<3x256xf32> to vector<1x256xf32>
    %12 = vector.broadcast %11 : vector<1x256xf32> to vector<8x256xf32>
    %13 = arith.addf %10, %12 : vector<8x256xf32>
    %cst_13 = arith.constant 0.000000e+00 : f32
    %14 = vector.broadcast %cst_13 : f32 to vector<8x256xf32>
    %15 = arith.maximumf %13, %14 : vector<8x256xf32>
    %16 = arith.truncf %15 : vector<8x256xf32> to vector<8x256xbf16>
    %c0_14 = arith.constant 0 : index
    %c0_15 = arith.constant 0 : index
    %c0_16 = arith.constant 0 : index
    %c0_17 = arith.constant 0 : index
    %17 = vector.load %arg4[%c0_14, %c0_15, %c0_16, %c0_17] : memref<2x2x256x256xbf16, #tpu.memory_space<vmem>>, vector<1x1x256x256xbf16>
    %18 = vector.shape_cast %17 : vector<1x1x256x256xbf16> to vector<256x256xbf16>
    %cst_18 = arith.constant dense<0.000000e+00> : vector<8x256xf32>
    %19 = tpu.matmul %16, %18, %cst_18 {dimension_numbers = #tpu.dot_dimension_numbers<[1], [0], [0], [1], [0, 0, 1, 1], [], []>} : vector<8x256xbf16>, vector<256x256xbf16>, vector<8x256xf32> -> vector<8x256xf32>
    %20 = vector.extract_strided_slice %7 {offsets = [1, 0], sizes = [1, 256], strides = [1, 1]} : vector<3x256xf32> to vector<1x256xf32>
    %21 = vector.broadcast %20 : vector<1x256xf32> to vector<8x256xf32>
    %22 = arith.addf %19, %21 : vector<8x256xf32>
    %cst_19 = arith.constant 0.000000e+00 : f32
    %23 = vector.broadcast %cst_19 : f32 to vector<8x256xf32>
    %24 = arith.maximumf %22, %23 : vector<8x256xf32>
    %25 = arith.truncf %24 : vector<8x256xf32> to vector<8x256xbf16>
    %c0_20 = arith.constant 0 : index
    %c1 = arith.constant 1 : index
    %c0_21 = arith.constant 0 : index
    %c0_22 = arith.constant 0 : index
    %26 = vector.load %arg4[%c0_20, %c1, %c0_21, %c0_22] : memref<2x2x256x256xbf16, #tpu.memory_space<vmem>>, vector<1x1x256x256xbf16>
    %27 = vector.shape_cast %26 : vector<1x1x256x256xbf16> to vector<256x256xbf16>
    %cst_23 = arith.constant dense<0.000000e+00> : vector<8x256xf32>
    %28 = tpu.matmul %25, %27, %cst_23 {dimension_numbers = #tpu.dot_dimension_numbers<[1], [0], [0], [1], [0, 0, 1, 1], [], []>} : vector<8x256xbf16>, vector<256x256xbf16>, vector<8x256xf32> -> vector<8x256xf32>
    %29 = vector.extract_strided_slice %7 {offsets = [2, 0], sizes = [1, 256], strides = [1, 1]} : vector<3x256xf32> to vector<1x256xf32>
    %30 = vector.broadcast %29 : vector<1x256xf32> to vector<8x256xf32>
    %31 = arith.addf %28, %30 : vector<8x256xf32>
    %cst_24 = arith.constant 0.000000e+00 : f32
    %32 = vector.broadcast %cst_24 : f32 to vector<8x256xf32>
    %33 = arith.maximumf %31, %32 : vector<8x256xf32>
    %34 = vector.extract_strided_slice %4 {offsets = [0, 0], sizes = [1, 256], strides = [1, 1]} : vector<2x256xf32> to vector<1x256xf32>
    %35 = vector.broadcast %34 : vector<1x256xf32> to vector<8x256xf32>
    %36 = arith.mulf %33, %35 : vector<8x256xf32>
    %cst_25 = arith.constant dense<0.000000e+00> : vector<8xf32>
    %37 = vector.multi_reduction <add>, %36, %cst_25 [1] : vector<8x256xf32> to vector<8xf32>
    %38 = vector.shape_cast %37 : vector<8xf32> to vector<8x1xf32>
    %c1_26 = arith.constant 1 : index
    %c0_27 = arith.constant 0 : index
    %c0_28 = arith.constant 0 : index
    %39 = vector.load %arg5[%c1_26, %c0_27, %c0_28] : memref<2x3x256xf32, #tpu.memory_space<vmem>>, vector<1x3x256xf32>
    %40 = vector.shape_cast %39 : vector<1x3x256xf32> to vector<3x256xf32>
    %c1_29 = arith.constant 1 : index
    %c0_30 = arith.constant 0 : index
    %c0_31 = arith.constant 0 : index
    %41 = vector.load %arg3[%c1_29, %c0_30, %c0_31] : memref<2x16x256xbf16, #tpu.memory_space<vmem>>, vector<1x16x256xbf16>
    %42 = vector.shape_cast %41 : vector<1x16x256xbf16> to vector<16x256xbf16>
    %cst_32 = arith.constant dense<0.000000e+00> : vector<8x256xf32>
    %43 = tpu.matmul %3, %42, %cst_32 {dimension_numbers = #tpu.dot_dimension_numbers<[1], [0], [0], [1], [0, 0, 1, 1], [], []>} : vector<8x16xbf16>, vector<16x256xbf16>, vector<8x256xf32> -> vector<8x256xf32>
    %44 = vector.extract_strided_slice %40 {offsets = [0, 0], sizes = [1, 256], strides = [1, 1]} : vector<3x256xf32> to vector<1x256xf32>
    %45 = vector.broadcast %44 : vector<1x256xf32> to vector<8x256xf32>
    %46 = arith.addf %43, %45 : vector<8x256xf32>
    %cst_33 = arith.constant 0.000000e+00 : f32
    %47 = vector.broadcast %cst_33 : f32 to vector<8x256xf32>
    %48 = arith.maximumf %46, %47 : vector<8x256xf32>
    %49 = arith.truncf %48 : vector<8x256xf32> to vector<8x256xbf16>
    %c1_34 = arith.constant 1 : index
    %c0_35 = arith.constant 0 : index
    %c0_36 = arith.constant 0 : index
    %c0_37 = arith.constant 0 : index
    %50 = vector.load %arg4[%c1_34, %c0_35, %c0_36, %c0_37] : memref<2x2x256x256xbf16, #tpu.memory_space<vmem>>, vector<1x1x256x256xbf16>
    %51 = vector.shape_cast %50 : vector<1x1x256x256xbf16> to vector<256x256xbf16>
    %cst_38 = arith.constant dense<0.000000e+00> : vector<8x256xf32>
    %52 = tpu.matmul %49, %51, %cst_38 {dimension_numbers = #tpu.dot_dimension_numbers<[1], [0], [0], [1], [0, 0, 1, 1], [], []>} : vector<8x256xbf16>, vector<256x256xbf16>, vector<8x256xf32> -> vector<8x256xf32>
    %53 = vector.extract_strided_slice %40 {offsets = [1, 0], sizes = [1, 256], strides = [1, 1]} : vector<3x256xf32> to vector<1x256xf32>
    %54 = vector.broadcast %53 : vector<1x256xf32> to vector<8x256xf32>
    %55 = arith.addf %52, %54 : vector<8x256xf32>
    %cst_39 = arith.constant 0.000000e+00 : f32
    %56 = vector.broadcast %cst_39 : f32 to vector<8x256xf32>
    %57 = arith.maximumf %55, %56 : vector<8x256xf32>
    %58 = arith.truncf %57 : vector<8x256xf32> to vector<8x256xbf16>
    %c1_40 = arith.constant 1 : index
    %c1_41 = arith.constant 1 : index
    %c0_42 = arith.constant 0 : index
    %c0_43 = arith.constant 0 : index
    %59 = vector.load %arg4[%c1_40, %c1_41, %c0_42, %c0_43] : memref<2x2x256x256xbf16, #tpu.memory_space<vmem>>, vector<1x1x256x256xbf16>
    %60 = vector.shape_cast %59 : vector<1x1x256x256xbf16> to vector<256x256xbf16>
    %cst_44 = arith.constant dense<0.000000e+00> : vector<8x256xf32>
    %61 = tpu.matmul %58, %60, %cst_44 {dimension_numbers = #tpu.dot_dimension_numbers<[1], [0], [0], [1], [0, 0, 1, 1], [], []>} : vector<8x256xbf16>, vector<256x256xbf16>, vector<8x256xf32> -> vector<8x256xf32>
    %62 = vector.extract_strided_slice %40 {offsets = [2, 0], sizes = [1, 256], strides = [1, 1]} : vector<3x256xf32> to vector<1x256xf32>
    %63 = vector.broadcast %62 : vector<1x256xf32> to vector<8x256xf32>
    %64 = arith.addf %61, %63 : vector<8x256xf32>
    %cst_45 = arith.constant 0.000000e+00 : f32
    %65 = vector.broadcast %cst_45 : f32 to vector<8x256xf32>
    %66 = arith.maximumf %64, %65 : vector<8x256xf32>
    %67 = vector.extract_strided_slice %4 {offsets = [1, 0], sizes = [1, 256], strides = [1, 1]} : vector<2x256xf32> to vector<1x256xf32>
    %68 = vector.broadcast %67 : vector<1x256xf32> to vector<8x256xf32>
    %69 = arith.mulf %66, %68 : vector<8x256xf32>
    %cst_46 = arith.constant dense<0.000000e+00> : vector<8xf32>
    %70 = vector.multi_reduction <add>, %69, %cst_46 [1] : vector<8x256xf32> to vector<8xf32>
    %71 = vector.shape_cast %70 : vector<8xf32> to vector<8x1xf32>
    %72 = tpu.concatenate %38, %71 in 1 : vector<8x1xf32>, vector<8x1xf32> -> vector<8x2xf32>
    %73 = vector.broadcast %5 : vector<1x2xf32> to vector<8x2xf32>
    %74 = arith.addf %72, %73 : vector<8x2xf32>
    %c0_47 = arith.constant 0 : index
    %c0_48 = arith.constant 0 : index
    %75 = vector.load %arg8[%c0_47, %c0_48] : memref<8x2xf32, #tpu.memory_space<vmem>>, vector<8x2xf32>
    tpu.vector_store %arg8[%c0_47, %c0_48], %74 {strides = array<i32>} : memref<8x2xf32, #tpu.memory_space<vmem>>, vector<8x2xf32>,
    return
  }
  func.func @transform_0(%arg0: i32) -> (i32, i32) {
    %c0_i32 = arith.constant 0 : i32
    %c0_i32_0 = arith.constant 0 : i32
    return %arg0, %c0_i32 : i32, i32
  }
  func.func @transform_1(%arg0: i32) -> (i32, i32) {
    %c0_i32 = arith.constant 0 : i32
    %c0_i32_0 = arith.constant 0 : i32
    return %arg0, %c0_i32 : i32, i32
  }
  func.func @transform_2(%arg0: i32) -> (i32, i32, i32) {
    %c0_i32 = arith.constant 0 : i32
    %c0_i32_0 = arith.constant 0 : i32
    %c0_i32_1 = arith.constant 0 : i32
    %c0_i32_2 = arith.constant 0 : i32
    return %c0_i32, %c0_i32_0, %c0_i32_1 : i32, i32, i32
  }
  func.func @transform_3(%arg0: i32) -> (i32, i32, i32, i32) {
    %c0_i32 = arith.constant 0 : i32
    %c0_i32_0 = arith.constant 0 : i32
    %c0_i32_1 = arith.constant 0 : i32
    %c0_i32_2 = arith.constant 0 : i32
    %c0_i32_3 = arith.constant 0 : i32
    return %c0_i32, %c0_i32_0, %c0_i32_1, %c0_i32_2 : i32, i32, i32, i32
  }
  func.func @transform_4(%arg0: i32) -> (i32, i32, i32) {
    %c0_i32 = arith.constant 0 : i32
    %c0_i32_0 = arith.constant 0 : i32
    %c0_i32_1 = arith.constant 0 : i32
    %c0_i32_2 = arith.constant 0 : i32
    return %c0_i32, %c0_i32_0, %c0_i32_1 : i32, i32, i32
  }
  func.func @transform_5(%arg0: i32) -> (i32, i32) {
    %c0_i32 = arith.constant 0 : i32
    %c0_i32_0 = arith.constant 0 : i32
    %c0_i32_1 = arith.constant 0 : i32
    return %c0_i32, %c0_i32_0 : i32, i32
  }
  func.func @transform_6(%arg0: i32) -> (i32, i32) {
    %c0_i32 = arith.constant 0 : i32
    %c0_i32_0 = arith.constant 0 : i32
    %c0_i32_1 = arith.constant 0 : i32
    return %c0_i32, %c0_i32_0 : i32, i32
  }
  func.func @transform_7(%arg0: i32) -> (i32, i32) {
    %c0_i32 = arith.constant 0 : i32
    %c0_i32_0 = arith.constant 0 : i32
    return %arg0, %c0_i32 : i32, i32
  }
}

</mosaic_0001>

<bundles_post_ra>
// kernel: twin_q_forward.1
= control target key start
LH: loop header
LB: loop body
LE: loop exit
PB: predicated region body
PF: predicated region fallthrough
CT: control target
= control target key end

     0   :  { %12 = vsyncpa [#allocation3], 0  ;;  %s1659_s24 = smov [#allocation2]   ;;  %s1811_s0 = inlined_call_operand.vmem [shape: f32[8,12], index: 0, kind: input, shape index: {}]   ;;  %s1812_s1 = inlined_call_operand.vmem [shape: f32[8,4], index: 1, kind: input, shape index: {}]   ;;  %s1813_s2 = inlined_call_operand.vmem [shape: bf16[2,16,256], index: 2, kind: input, shape index: {}]   ;;  %s1814_s3 = inlined_call_operand.hbm [shape: bf16[2,2,256,256], index: 3, kind: input, shape index: {}]   ;;  %s1815_s4 = inlined_call_operand.vmem [shape: f32[2,3,256], index: 4, kind: input, shape index: {}]   ;;  %s1816_s5 = inlined_call_operand.vmem [shape: f32[2,256], index: 5, kind: input, shape index: {}]   ;;  %s1817_s6 = inlined_call_operand.vmem [shape: f32[1,2], index: 6, kind: input, shape index: {}]   ;;  %s1818_s7 = inlined_call_operand.vmem [shape: f32[8,2], index: 7, kind: output, shape index: {}]  }
   0x1   :  { %s24_s25 = sshll.u32 %s1659_s24, 4  ;;  %s1635_s28 = scalar_lea.hbm %s1814_s3, 16384  ;;  %s25_s25 = int_to_ptr.vmem [resolvable:$true] %s24_s25 }
   0x2   :  { %p1636_p0 = scmp.ne.s32.totalorder %s1814_s3, %s1635_s28  ;;  %p1639_p1 = scmp.lt.u32.totalorder %s1635_s28, %s1814_s3 }
   0x4   :  { %p1641_p2 = pnand %p1639_p1, %p1636_p0 }
   0x6   :  { %1644 = shalt.err (!%p1641_p2)
}
   0x7   :  { %s1645_s10 = scalar_lea.vmem %s25_s25, 16384  ;;  %p1650_p4 = scmp.lt.s32.totalorder %s25_s25, %s25_s25 }
   0x8   :  { %p1646_p3 = scmp.ne.s32.totalorder %s25_s25, %s1645_s10  ;;  %p1651_p5 = scmp.lt.s32.totalorder %s1645_s10, %s1645_s10 }
   0xa   :  { %p1652_p6 = por %p1651_p5, %p1650_p4 }
   0xc   :  { %p1653_p7 = pnand %p1652_p6, %p1646_p3 }
   0xe   :  { %1656 = shalt.err (!%p1653_p7)
}
   0xf   :  { %s1660_s11 = smov 128   ;;  %s1661_s12 = smov 8  }
  0x10   :  { %30 = dma.hbm_to_vmem [thread:$0]  %s1814_s3, 16384, %s25_s25, [#allocation3], %s1660_s11, %s1660_s11, %s1661_s12  }
  0x11   :  { %1657 = dma.done.wait [#allocation3], 16384  }
  0x12   :  { %1658 = vsyncadd [#allocation3], 4294950912  ;;  %v1662_v0 = vmov 0   ;;  %v42_v1 = vld [vmem:[%s1812_s1] sm:$0xff]  ;;  %s1663_s17 = smov 12   ;;  %vm47_vm0 = vcmask 97280  }
  0x13   :  { %120 = vmatprep.mubr.bf16.mxu0 %v1662_v0  ;;  %44 = vrot.lane.b32.xlu0 %v42_v1, %s1663_s17  ;;  %v1437_v2 = vld [vmem:[%s1813_s2 + $0x4] ss:$8 sps:$4 sm:$0xff]   ;;  %v1439_v3 = vld [vmem:[%s1813_s2] ss:$8 sps:$4 sm:$0xff]   ;;  %v1443_v6 = vld [vmem:[#allocation2 + $0x14] ss:$8 sps:$4 sm:$0xff]  }
  0x14   :  { %v1440_v4 = vld [vmem:[#allocation2 + $0x4] ss:$8 sps:$4 sm:$0xff]   ;;  %88 = vmatprep.subr.bf16.mxu0 %v1437_v2  ;;  %v1442_v5 = vld [vmem:[#allocation2] ss:$8 sps:$4 sm:$0xff]   ;;  %v1445_v7 = vld [vmem:[#allocation2 + $0x10] ss:$8 sps:$4 sm:$0xff]  }
  0x15   :  { %89 = vmatpush1.bf16.msra.mxu0 %v1439_v3  ;;  %343 = vmatprep.subr.bf16.mxu1 %v1440_v4  ;;  %v1446_v8 = vld [vmem:[#allocation2 + $0x24] ss:$8 sps:$4 sm:$0xff]   ;;  %v1448_v9 = vld [vmem:[#allocation2 + $0x20] ss:$8 sps:$4 sm:$0xff]   ;;  %v1449_v10 = vld [vmem:[#allocation2 + $0x34] ss:$8 sps:$4 sm:$0xff]  }
  0x16   :  { %344 = vmatpush1.bf16.msra.mxu1 %v1442_v5  ;;  %v1451_v11 = vld [vmem:[#allocation2 + $0x30] ss:$8 sps:$4 sm:$0xff]   ;;  %v1452_v12 = vld [vmem:[#allocation2 + $0x44] ss:$8 sps:$4 sm:$0xff]   ;;  %v1454_v13 = vld [vmem:[#allocation2 + $0x40] ss:$8 sps:$4 sm:$0xff]  }
  0x17   :  { %345 = vmatprep.subr.bf16.mxu1 %v1443_v6  ;;  %v1455_v14 = vld [vmem:[#allocation2 + $0x54] ss:$8 sps:$4 sm:$0xff]   ;;  %v1457_v15 = vld [vmem:[#allocation2 + $0x50] ss:$8 sps:$4 sm:$0xff]   ;;  %v1458_v16 = vld [vmem:[#allocation2 + $0x64] ss:$8 sps:$4 sm:$0xff]   ;;  %v56_v6 = vlaneseq }
  0x18   :  { %v1460_v17 = vld [vmem:[#allocation2 + $0x60] ss:$8 sps:$4 sm:$0xff]   ;;  %v1461_v18 = vld [vmem:[#allocation2 + $0x74] ss:$8 sps:$4 sm:$0xff]   ;;  %v1463_v19 = vld [vmem:[#allocation2 + $0x70] ss:$8 sps:$4 sm:$0xff]  }
  0x19   :  { %v1464_v20 = vld [vmem:[#allocation2 + $0x84] ss:$8 sps:$4 sm:$0xff]   ;;  %v1466_v21 = vld [vmem:[#allocation2 + $0x80] ss:$8 sps:$4 sm:$0xff]   ;;  %v1467_v22 = vld [vmem:[#allocation2 + $0x94] ss:$8 sps:$4 sm:$0xff]  }
  0x1a   :  { %346 = vmatpush1.bf16.msra.mxu1 %v1445_v7  ;;  %v1469_v23 = vld [vmem:[#allocation2 + $0x90] ss:$8 sps:$4 sm:$0xff]   ;;  %v1470_v24 = vld [vmem:[#allocation2 + $0xa4] ss:$8 sps:$4 sm:$0xff]   ;;  %v1472_v25 = vld [vmem:[#allocation2 + $0xa0] ss:$8 sps:$4 sm:$0xff]  }
  0x1b   :  { %347 = vmatprep.subr.bf16.mxu1 %v1446_v8  ;;  %v1473_v26 = vld [vmem:[#allocation2 + $0xb4] ss:$8 sps:$4 sm:$0xff]   ;;  %v1475_v27 = vld [vmem:[#allocation2 + $0xb0] ss:$8 sps:$4 sm:$0xff]   ;;  %v1476_v28 = vld [vmem:[#allocation2 + $0xc4] ss:$8 sps:$4 sm:$0xff]  }
  0x1c   :  { %v1478_v29 = vld [vmem:[#allocation2 + $0xc0] ss:$8 sps:$4 sm:$0xff]   ;;  %v1479_v30 = vld [vmem:[#allocation2 + $0xd4] ss:$8 sps:$4 sm:$0xff]   ;;  %v1481_v31 = vld [vmem:[#allocation2 + $0xd0] ss:$8 sps:$4 sm:$0xff]  }
  0x1d   :  { %v41_v32 = vld [vmem:[%s1811_s0] sm:$0xff]  ;;  %vm84_vm1 = vcmask 130048   ;;  %v1485_v38 = vld [vmem:[#allocation2 + $0xf4] ss:$8 sps:$4 sm:$0xff]   ;;  %v1487_v39 = vld [vmem:[#allocation2 + $0xf0] ss:$8 sps:$4 sm:$0xff]  }
  0x1e   :  { %348 = vmatpush1.bf16.msra.mxu1 %v1448_v9  ;;  %v1482_v36 = vld [vmem:[#allocation2 + $0xe4] ss:$8 sps:$4 sm:$0xff]   ;;  %v1484_v37 = vld [vmem:[#allocation2 + $0xe0] ss:$8 sps:$4 sm:$0xff]   ;;  %v1490_v40 = vld [vmem:[%s1813_s2 + $0x14] ss:$8 sps:$4 sm:$0xff]  }
  0x1f   :  { %349 = vmatprep.subr.bf16.mxu1 %v1449_v10  ;;  %v1491_v41 = vld [vmem:[#allocation2 + $0x100] ss:$8 sps:$4 sm:$0xff]   ;;  %v1493_v42 = vld [vmem:[#allocation2 + $0x104] ss:$8 sps:$4 sm:$0xff]   ;;  %v1496_v43 = vld [vmem:[#allocation2 + $0x114] ss:$8 sps:$4 sm:$0xff]  }
  0x20   :  { %599 = vmatprep.subr.bf16.mxu0 %v1493_v42  ;;  %v1494_v44 = vld [vmem:[#allocation2 + $0x110] ss:$8 sps:$4 sm:$0xff]   ;;  %v1499_v45 = vld [vmem:[#allocation2 + $0x124] ss:$8 sps:$4 sm:$0xff]   ;;  %v1497_v46 = vld [vmem:[#allocation2 + $0x120] ss:$8 sps:$4 sm:$0xff]  }
  0x21   :  { %v1502_v47 = vld [vmem:[#allocation2 + $0x134] ss:$8 sps:$4 sm:$0xff]   ;;  %v1500_v48 = vld [vmem:[#allocation2 + $0x130] ss:$8 sps:$4 sm:$0xff]   ;;  %v1505_v49 = vld [vmem:[#allocation2 + $0x144] ss:$8 sps:$4 sm:$0xff]  }
  0x22   :  { %350 = vmatpush1.bf16.msra.mxu1 %v1451_v11  ;;  %v1503_v50 = vld [vmem:[#allocation2 + $0x140] ss:$8 sps:$4 sm:$0xff]   ;;  %v1508_v51 = vld [vmem:[#allocation2 + $0x154] ss:$8 sps:$4 sm:$0xff]   ;;  %v1506_v52 = vld [vmem:[#allocation2 + $0x150] ss:$8 sps:$4 sm:$0xff]  }
  0x23   :  { %351 = vmatprep.subr.bf16.mxu1 %v1452_v12  ;;  %v1511_v53 = vld [vmem:[#allocation2 + $0x164] ss:$8 sps:$4 sm:$0xff]   ;;  %v1509_v54 = vld [vmem:[#allocation2 + $0x160] ss:$8 sps:$4 sm:$0xff]   ;;  %v1514_v55 = vld [vmem:[#allocation2 + $0x174] ss:$8 sps:$4 sm:$0xff]  }
  0x24   :  { %v1512_v56 = vld [vmem:[#allocation2 + $0x170] ss:$8 sps:$4 sm:$0xff]   ;;  %v1517_v57 = vld [vmem:[#allocation2 + $0x184] ss:$8 sps:$4 sm:$0xff]   ;;  %v1515_v58 = vld [vmem:[#allocation2 + $0x180] ss:$8 sps:$4 sm:$0xff]  }
  0x25   :  { %v1520_v59 = vld [vmem:[#allocation2 + $0x194] ss:$8 sps:$4 sm:$0xff]   ;;  %v1518_v60 = vld [vmem:[#allocation2 + $0x190] ss:$8 sps:$4 sm:$0xff]   ;;  %v1523_v61 = vld [vmem:[#allocation2 + $0x1a4] ss:$8 sps:$4 sm:$0xff]  }
  0x26   :  { %352 = vmatpush1.bf16.msra.mxu1 %v1454_v13  ;;  %v1521_v62 = vld [vmem:[#allocation2 + $0x1a0] ss:$8 sps:$4 sm:$0xff]   ;;  %v1526_v63 = vld [vmem:[#allocation2 + $0x1b4] ss:$8 sps:$4 sm:$0xff]   ;;  %v1524_v1 = vld [vmem:[#allocation2 + $0x1b0] ss:$8 sps:$4 sm:$0xff]  }
  0x27   :  { %353 = vmatprep.subr.bf16.mxu1 %v1455_v14  ;;  %v1529_v2 = vld [vmem:[#allocation2 + $0x1c4] ss:$8 sps:$4 sm:$0xff]   ;;  %v1527_v3 = vld [vmem:[#allocation2 + $0x1c0] ss:$8 sps:$4 sm:$0xff]   ;;  %v1532_v4 = vld [vmem:[#allocation2 + $0x1d4] ss:$8 sps:$4 sm:$0xff]  }
  0x28   :  { %v1530_v5 = vld [vmem:[#allocation2 + $0x1d0] ss:$8 sps:$4 sm:$0xff]   ;;  %v1736_v7 = vshrl.u32 %v56_v6, 7  ;;  %v1744_v9 = vld [vmem:[%s1815_s4] sm:$0x77]  ;;  %vm1278_vm2 = vcmask 7168  }
  0x29   :  { %v1562_v6 = vld [vmem:[#allocation2 + $0x274] ss:$8 sps:$4 sm:$0xff]   ;;  %vm1287_vm3 = vcmask 15360  }
  0x2a   :  { %354 = vmatpush1.bf16.msra.mxu1 %v1457_v15  ;;  %v1739_v8 = vsub.s32 0, %v1736_v7  ;;  %v62_v10 = vsub.s32 4, %v1736_v7 }
  0x2b   :  { %355 = vmatprep.subr.bf16.mxu1 %v1458_v16 }
  0x2c   :  { %v59_v11 = vrot.slane %v1744_v9, %v1739_v8  ;;  %v63_v12 = vrot.slane %v1744_v9, %v62_v10 }
  0x2e   :  { %356 = vmatpush1.bf16.msra.mxu1 %v1460_v17  ;;  %v69_v13 = vrot.slane %v59_v11, %v1739_v8  ;;  %v73_v14 = vrot.slane %v63_v12, %v1739_v8  ;;  %v1565_v11 = vld [vmem:[#allocation2 + $0x284] ss:$8 sps:$4 sm:$0xff]   ;;  %v1563_v12 = vld [vmem:[#allocation2 + $0x280] ss:$8 sps:$4 sm:$0xff]  }
  0x2f   :  { %357 = vmatprep.subr.bf16.mxu1 %v1461_v18 }
  0x32   :  { %358 = vmatpush1.bf16.msra.mxu1 %v1463_v19 }
  0x33   :  { %359 = vmatprep.subr.bf16.mxu1 %v1464_v20 }
  0x36   :  { %360 = vmatpush1.bf16.msra.mxu1 %v1466_v21 }
  0x37   :  { %361 = vmatprep.subr.bf16.mxu1 %v1467_v22 }
  0x3a   :  { %362 = vmatpush1.bf16.msra.mxu1 %v1469_v23 }
  0x3b   :  { %363 = vmatprep.subr.bf16.mxu1 %v1470_v24  ;;  %v1488_v24 = vld [vmem:[%s1813_s2 + $0x10] ss:$8 sps:$4 sm:$0xff]  }
  0x3e   :  { %364 = vmatpush1.bf16.msra.mxu1 %v1472_v25 }
  0x3f   :  { %365 = vmatprep.subr.bf16.mxu1 %v1473_v26  ;;  %v1535_v26 = vld [vmem:[#allocation2 + $0x1e4] ss:$8 sps:$4 sm:$0xff]  }
  0x42   :  { %366 = vmatpush1.bf16.msra.mxu1 %v1475_v27  ;;  %v1533_v27 = vld [vmem:[#allocation2 + $0x1e0] ss:$8 sps:$4 sm:$0xff]  }
  0x43   :  { %367 = vmatprep.subr.bf16.mxu1 %v1476_v28  ;;  %v1538_v28 = vld [vmem:[#allocation2 + $0x1f4] ss:$8 sps:$4 sm:$0xff]  }
  0x46   :  { %368 = vmatpush1.bf16.msra.mxu1 %v1478_v29  ;;  %v1536_v29 = vld [vmem:[#allocation2 + $0x1f0] ss:$8 sps:$4 sm:$0xff]  }
  0x47   :  { %369 = vmatprep.subr.bf16.mxu1 %v1479_v30  ;;  %v1541_v30 = vld [vmem:[#allocation2 + $0x204] ss:$8 sps:$4 sm:$0xff]  }
  0x4a   :  { %370 = vmatpush1.bf16.msra.mxu1 %v1481_v31  ;;  %v1759_v31 = vsub.s32 1, %v1736_v7 }
  0x4b   :  { %371 = vmatprep.subr.bf16.mxu1 %v1482_v36  ;;  %v1772_v36 = vld [vmem:[%s1815_s4 + $0x8] sm:$0x77] }
  0x4c   :  { %v679_v42 = vrot.slane %v1772_v36, %v62_v10  ;;  %v1560_v10 = vld [vmem:[#allocation2 + $0x270] ss:$8 sps:$4 sm:$0xff]  }
  0x4e   :  { %372 = vmatpush1.bf16.msra.mxu1 %v1484_v37 }
  0x4f   :  { %373 = vmatprep.subr.bf16.mxu1 %v1485_v38 }
  0x52   :  { %374 = vmatpush1.bf16.msra.mxu1 %v1487_v39 }
  0x53   :  { %700 = vmatprep.subr.bf16.mxu1 %v1490_v40 }
  0x85   :  { %v45_v33 = vpop.permute.xlu0 %44 }
  0x86   :  { %v48_v34 = vsel %vm47_vm0, %v41_v32, %v45_v33  ;;  %v171_v32 = vsub.s32 5, %v1736_v7 }
  0x87   :  { %v1729_v35 = vpack.c.bf16 %v48_v34, %v48_v34 }
  0x88   :  { %v172_v33 = vrot.slane %v1744_v9, %v171_v32 }
  0x89   :  { %1296 = vmatmul.mubr.msk.bf16.vlgmr.msra.gmra.mrb[0].mxu0 %vm84_vm1, %v1729_v35 }
  0x8a   :  { %600 = vmatpush1.bf16.msra.mxu0 %v1491_v41 }
  0x8b   :  { %601 = vmatprep.subr.bf16.mxu0 %v1496_v43 }
  0x8e   :  { %602 = vmatpush1.bf16.msra.mxu0 %v1494_v44 }
  0x8f   :  { %603 = vmatprep.subr.bf16.mxu0 %v1499_v45 }
  0x92   :  { %604 = vmatpush1.bf16.msra.mxu0 %v1497_v46 }
  0x93   :  { %605 = vmatprep.subr.bf16.mxu0 %v1502_v47  ;;  %v1539_v47 = vld [vmem:[#allocation2 + $0x200] ss:$8 sps:$4 sm:$0xff]  }
  0x96   :  { %606 = vmatpush1.bf16.msra.mxu0 %v1500_v48  ;;  %v689_v48 = vrot.slane %v679_v42, %v1739_v8  ;;  %v1601_v42 = vld [vmem:[#allocation2 + $0x344] ss:$8 sps:$4 sm:$0xff]  }
  0x97   :  { %607 = vmatprep.subr.bf16.mxu0 %v1505_v49 }
  0x9a   :  { %608 = vmatpush1.bf16.msra.mxu0 %v1503_v50  ;;  %v1544_v50 = vld [vmem:[#allocation2 + $0x214] ss:$8 sps:$4 sm:$0xff]  }
  0x9b   :  { %609 = vmatprep.subr.bf16.mxu0 %v1508_v51 }
  0x9e   :  { %610 = vmatpush1.bf16.msra.mxu0 %v1506_v52 }
  0x9f   :  { %611 = vmatprep.subr.bf16.mxu0 %v1511_v53 }
  0xa2   :  { %612 = vmatpush1.bf16.msra.mxu0 %v1509_v54 }
  0xa3   :  { %613 = vmatprep.subr.bf16.mxu0 %v1514_v55  ;;  %v1542_v55 = vld [vmem:[#allocation2 + $0x210] ss:$8 sps:$4 sm:$0xff]  }
  0xa6   :  { %614 = vmatpush1.bf16.msra.mxu0 %v1512_v56 }
  0xa7   :  { %615 = vmatprep.subr.bf16.mxu0 %v1517_v57  ;;  %v1547_v57 = vld [vmem:[#allocation2 + $0x224] ss:$8 sps:$4 sm:$0xff]  }
  0xaa   :  { %616 = vmatpush1.bf16.msra.mxu0 %v1515_v58 }
  0xab   :  { %617 = vmatprep.subr.bf16.mxu0 %v1520_v59 }
  0xae   :  { %618 = vmatpush1.bf16.msra.mxu0 %v1518_v60  ;;  %v1545_v60 = vld [vmem:[#allocation2 + $0x220] ss:$8 sps:$4 sm:$0xff]  }
  0xaf   :  { %619 = vmatprep.subr.bf16.mxu0 %v1523_v61  ;;  %v1550_v61 = vld [vmem:[#allocation2 + $0x234] ss:$8 sps:$4 sm:$0xff]  }
  0xb2   :  { %620 = vmatpush1.bf16.msra.mxu0 %v1521_v62  ;;  %v1548_v62 = vld [vmem:[#allocation2 + $0x230] ss:$8 sps:$4 sm:$0xff]  }
  0xb3   :  { %621 = vmatprep.subr.bf16.mxu0 %v1526_v63  ;;  %v1553_v63 = vld [vmem:[#allocation2 + $0x244] ss:$8 sps:$4 sm:$0xff]  }
  0xb6   :  { %622 = vmatpush1.bf16.msra.mxu0 %v1524_v1  ;;  %v1551_v1 = vld [vmem:[#allocation2 + $0x240] ss:$8 sps:$4 sm:$0xff]  }
  0xb7   :  { %623 = vmatprep.subr.bf16.mxu0 %v1529_v2  ;;  %v1556_v2 = vld [vmem:[#allocation2 + $0x254] ss:$8 sps:$4 sm:$0xff]  }
  0xba   :  { %624 = vmatpush1.bf16.msra.mxu0 %v1527_v3  ;;  %v1554_v3 = vld [vmem:[#allocation2 + $0x250] ss:$8 sps:$4 sm:$0xff]  }
  0xbb   :  { %625 = vmatprep.subr.bf16.mxu0 %v1532_v4  ;;  %v1559_v4 = vld [vmem:[#allocation2 + $0x264] ss:$8 sps:$4 sm:$0xff]  }
  0xbe   :  { %626 = vmatpush1.bf16.msra.mxu0 %v1530_v5  ;;  %v1557_v5 = vld [vmem:[#allocation2 + $0x260] ss:$8 sps:$4 sm:$0xff]  }
  0xbf   :  { %627 = vmatprep.subr.bf16.mxu0 %v1535_v26  ;;  %v1581_v26 = vld [vmem:[#allocation2 + $0x2e0] ss:$8 sps:$4 sm:$0xff]  }
  0xc2   :  { %628 = vmatpush1.bf16.msra.mxu0 %v1533_v27 }
  0xc3   :  { %629 = vmatprep.subr.bf16.mxu0 %v1538_v28  ;;  %v1586_v28 = vld [vmem:[#allocation2 + $0x2f4] ss:$8 sps:$4 sm:$0xff]  }
  0xc6   :  { %630 = vmatpush1.bf16.msra.mxu0 %v1536_v29  ;;  %v1584_v29 = vld [vmem:[#allocation2 + $0x2f0] ss:$8 sps:$4 sm:$0xff]  }
  0xc7   :  { %956 = vmatprep.subr.bf16.mxu0 %v1541_v30 }
 0x15c   :  { %v122_v15 = vpop.f32.mrb[0].mxu0 }
 0x15d   :  { %v123_v16 = vadd.f32 %v122_v15, %v69_v13  ;;  %v124_v17 = vpop.f32.mrb[1].mxu0  ;;  %v1568_v13 = vld [vmem:[#allocation2 + $0x294] ss:$8 sps:$4 sm:$0xff]   ;;  %v1571_v15 = vld [vmem:[#allocation2 + $0x2a4] ss:$8 sps:$4 sm:$0xff]  }
 0x15e   :  { %v125_v18 = vadd.f32 %v124_v17, %v73_v14  ;;  %v126_v19 = vpop.f32.mrb[2].mxu0  ;;  %v1566_v14 = vld [vmem:[#allocation2 + $0x290] ss:$8 sps:$4 sm:$0xff]   ;;  %v1574_v17 = vld [vmem:[#allocation2 + $0x2b4] ss:$8 sps:$4 sm:$0xff]  }
 0x15f   :  { %v129_v20 = vmax.f32 %v123_v16, 0.0  ;;  %v127_v21 = vpop.f32.mrb[3].mxu0  ;;  %v1569_v16 = vld [vmem:[#allocation2 + $0x2a0] ss:$8 sps:$4 sm:$0xff]   ;;  %v1577_v19 = vld [vmem:[#allocation2 + $0x2c4] ss:$8 sps:$4 sm:$0xff]  }
 0x160   :  { %v130_v22 = vmax.f32 %v125_v18, 0.0  ;;  %v1572_v18 = vld [vmem:[#allocation2 + $0x2b0] ss:$8 sps:$4 sm:$0xff]   ;;  %v675_v21 = vrot.slane %v1772_v36, %v1739_v8 }
 0x161   :  { %v131_v25 = vpack.c.bf16 %v129_v20, %v129_v20  ;;  %v1575_v20 = vld [vmem:[#allocation2 + $0x2c0] ss:$8 sps:$4 sm:$0xff]  }
 0x162   :  { %v132_v23 = vpack.c.bf16 %v130_v22, %v130_v22  ;;  %v1580_v22 = vld [vmem:[#allocation2 + $0x2d4] ss:$8 sps:$4 sm:$0xff]  }
 0x164   :  { %375 = vmatprep.mubr.bf16.mxu1 %v132_v23  ;;  %v1578_v23 = vld [vmem:[#allocation2 + $0x2d0] ss:$8 sps:$4 sm:$0xff]  }
 0x165   :  { %376 = vmatmul.mubr.bf16.vlgmr.msra.gmra.mrb[0].mxu1 %v131_v25  ;;  %v1583_v25 = vld [vmem:[#allocation2 + $0x2e4] ss:$8 sps:$4 sm:$0xff]  }
 0x166   :  { %701 = vmatpush1.bf16.msra.mxu1 %v1488_v24  ;;  %732 = vmatprep.mubr.bf16.mxu1 %v1662_v0  ;;  %v168_v0 = vrot.slane %v1744_v9, %v1759_v31  ;;  %v685_v24 = vrot.slane %v675_v21, %v1739_v8 }
 0x168   :  { %v178_v34 = vrot.slane %v168_v0, %v1759_v31 }
 0x16d   :  { %1366 = vmatmul.mubr.msk.bf16.vlgmr.msra.gmra.mrb[4].mxu1 %vm84_vm1, %v1729_v35  ;;  %v182_v35 = vrot.slane %v172_v33, %v1759_v31  ;;  %v1587_v33 = vld [vmem:[#allocation2 + $0x300] ss:$8 sps:$4 sm:$0xff]  }
 0x238   :  { %v377_v37 = vpop.f32.mrb[0].mxu1 }
 0x239   :  { %v378_v38 = vadd.f32 %v377_v37, %v178_v34  ;;  %v379_v39 = vpop.f32.mrb[1].mxu1  ;;  %v1589_v34 = vld [vmem:[#allocation2 + $0x304] ss:$8 sps:$4 sm:$0xff]   ;;  %v1592_v37 = vld [vmem:[#allocation2 + $0x314] ss:$8 sps:$4 sm:$0xff]  }
 0x23a   :  { %v380_v40 = vadd.f32 %v379_v39, %v182_v35  ;;  %v381_v41 = vpop.f32.mrb[2].mxu1  ;;  %1212 = vmatprep.subr.bf16.mxu1 %v1589_v34  ;;  %v1590_v35 = vld [vmem:[#allocation2 + $0x310] ss:$8 sps:$4 sm:$0xff]   ;;  %v1593_v39 = vld [vmem:[#allocation2 + $0x320] ss:$8 sps:$4 sm:$0xff]  }
 0x23b   :  { %v384_v43 = vmax.f32 %v378_v38, 0.0  ;;  %v382_v44 = vpop.f32.mrb[3].mxu1  ;;  %1213 = vmatpush1.bf16.msra.mxu1 %v1587_v33  ;;  %v1595_v38 = vld [vmem:[#allocation2 + $0x324] ss:$8 sps:$4 sm:$0xff]   ;;  %v1596_v41 = vld [vmem:[#allocation2 + $0x330] ss:$8 sps:$4 sm:$0xff]  }
 0x23c   :  { %v385_v45 = vmax.f32 %v380_v40, 0.0  ;;  %1214 = vmatprep.subr.bf16.mxu1 %v1592_v37  ;;  %v1598_v40 = vld [vmem:[#allocation2 + $0x334] ss:$8 sps:$4 sm:$0xff]  }
 0x23d   :  { %v386_v49 = vpack.c.bf16 %v384_v43, %v384_v43  ;;  %v1599_v43 = vld [vmem:[#allocation2 + $0x340] ss:$8 sps:$4 sm:$0xff]   ;;  %v1604_v44 = vld [vmem:[#allocation2 + $0x354] ss:$8 sps:$4 sm:$0xff]  }
 0x23e   :  { %v387_v46 = vpack.c.bf16 %v385_v45, %v385_v45  ;;  %v1602_v45 = vld [vmem:[#allocation2 + $0x350] ss:$8 sps:$4 sm:$0xff]  }
 0x23f   :  { %1215 = vmatpush1.bf16.msra.mxu1 %v1590_v35 }
 0x240   :  { %631 = vmatprep.mubr.bf16.mxu0 %v387_v46  ;;  %v1776_v51 = vpop.f32.mrb[4].mxu1  ;;  %1216 = vmatprep.subr.bf16.mxu1 %v1595_v38  ;;  %v1607_v46 = vld [vmem:[#allocation2 + $0x364] ss:$8 sps:$4 sm:$0xff]  }
 0x241   :  { %632 = vmatmul.mubr.bf16.vlgmr.msra.gmra.mrb[4].mxu0 %v386_v49  ;;  %v736_v52 = vpop.f32.mrb[5].mxu1  ;;  %v735_v27 = vadd.f32 %v1776_v51, %v685_v24  ;;  %v1608_v49 = vld [vmem:[#allocation2 + $0x370] ss:$8 sps:$4 sm:$0xff]   ;;  %v1611_v51 = vld [vmem:[#allocation2 + $0x380] ss:$8 sps:$4 sm:$0xff]  }
 0x242   :  { %v737_v53 = vadd.f32 %v736_v52, %v689_v48  ;;  %957 = vmatpush1.bf16.msra.mxu0 %v1539_v47  ;;  %v738_v54 = vpop.f32.mrb[6].mxu1  ;;  %v1605_v47 = vld [vmem:[#allocation2 + $0x360] ss:$8 sps:$4 sm:$0xff]   ;;  %v1610_v48 = vld [vmem:[#allocation2 + $0x374] ss:$8 sps:$4 sm:$0xff]  }
 0x243   :  { %v739_v56 = vpop.f32.mrb[7].mxu1  ;;  %958 = vmatprep.subr.bf16.mxu0 %v1544_v50  ;;  %v741_v30 = vmax.f32 %v735_v27, 0.0  ;;  %1217 = vmatpush1.bf16.msra.mxu1 %v1593_v39  ;;  %v1613_v50 = vld [vmem:[#allocation2 + $0x384] ss:$8 sps:$4 sm:$0xff]   ;;  %v1616_v52 = vld [vmem:[#allocation2 + $0x394] ss:$8 sps:$4 sm:$0xff]   ;;  %v781_v27 = vrot.slane %v1772_v36, %v1759_v31 }
 0x244   :  { %v742_v58 = vmax.f32 %v737_v53, 0.0  ;;  %1218 = vmatprep.subr.bf16.mxu1 %v1598_v40  ;;  %v1614_v53 = vld [vmem:[#allocation2 + $0x390] ss:$8 sps:$4 sm:$0xff]   ;;  %v1619_v54 = vld [vmem:[#allocation2 + $0x3a4] ss:$8 sps:$4 sm:$0xff]  }
 0x245   :  { %v743_v0 = vpack.c.bf16 %v741_v30, %v741_v30  ;;  %v1622_v56 = vld [vmem:[#allocation2 + $0x3b4] ss:$8 sps:$4 sm:$0xff]  }
 0x246   :  { %v744_v59 = vpack.c.bf16 %v742_v58, %v742_v58  ;;  %959 = vmatpush1.bf16.msra.mxu0 %v1542_v55  ;;  %v1617_v55 = vld [vmem:[#allocation2 + $0x3a0] ss:$8 sps:$4 sm:$0xff]   ;;  %v1625_v58 = vld [vmem:[#allocation2 + $0x3c4] ss:$8 sps:$4 sm:$0xff]  }
 0x247   :  { %960 = vmatprep.subr.bf16.mxu0 %v1547_v57  ;;  %1219 = vmatpush1.bf16.msra.mxu1 %v1596_v41  ;;  %v1620_v57 = vld [vmem:[#allocation2 + $0x3b0] ss:$8 sps:$4 sm:$0xff]  }
 0x248   :  { %988 = vmatprep.mubr.bf16.mxu0 %v744_v59  ;;  %1220 = vmatprep.subr.bf16.mxu1 %v1601_v42  ;;  %v1623_v59 = vld [vmem:[#allocation2 + $0x3c0] ss:$8 sps:$4 sm:$0xff]  }
 0x24a   :  { %961 = vmatpush1.bf16.msra.mxu0 %v1545_v60  ;;  %v1628_v60 = vld [vmem:[#allocation2 + $0x3d4] ss:$8 sps:$4 sm:$0xff]  }
 0x24b   :  { %962 = vmatprep.subr.bf16.mxu0 %v1550_v61  ;;  %1221 = vmatpush1.bf16.msra.mxu1 %v1599_v43  ;;  %v1626_v61 = vld [vmem:[#allocation2 + $0x3d0] ss:$8 sps:$4 sm:$0xff]   ;;  %v1261_v43 = vsub.s32 3, %v1736_v7 }
 0x24c   :  { %1222 = vmatprep.subr.bf16.mxu1 %v1604_v44 }
 0x24e   :  { %963 = vmatpush1.bf16.msra.mxu0 %v1548_v62  ;;  %v1631_v62 = vld [vmem:[#allocation2 + $0x3e4] ss:$8 sps:$4 sm:$0xff]  }
 0x24f   :  { %964 = vmatprep.subr.bf16.mxu0 %v1553_v63  ;;  %1223 = vmatpush1.bf16.msra.mxu1 %v1602_v45  ;;  %v1629_v63 = vld [vmem:[#allocation2 + $0x3e0] ss:$8 sps:$4 sm:$0xff]  }
 0x250   :  { %1224 = vmatprep.subr.bf16.mxu1 %v1607_v46 }
 0x252   :  { %965 = vmatpush1.bf16.msra.mxu0 %v1551_v1  ;;  %v1634_v1 = vld [vmem:[#allocation2 + $0x3f4] ss:$8 sps:$4 sm:$0xff]  }
 0x253   :  { %966 = vmatprep.subr.bf16.mxu0 %v1556_v2  ;;  %1225 = vmatpush1.bf16.msra.mxu1 %v1605_v47  ;;  %v1632_v2 = vld [vmem:[#allocation2 + $0x3f0] ss:$8 sps:$4 sm:$0xff]  }
 0x254   :  { %1226 = vmatprep.subr.bf16.mxu1 %v1610_v48 }
 0x256   :  { %967 = vmatpush1.bf16.msra.mxu0 %v1554_v3  ;;  %v423_v3 = vsub.s32 2, %v1736_v7 }
 0x257   :  { %968 = vmatprep.subr.bf16.mxu0 %v1559_v4  ;;  %1227 = vmatpush1.bf16.msra.mxu1 %v1608_v49  ;;  %v427_v4 = vsub.s32 6, %v1736_v7 }
 0x258   :  { %1228 = vmatprep.subr.bf16.mxu1 %v1613_v50  ;;  %v1037_v42 = vrot.slane %v1772_v36, %v423_v3 }
 0x25a   :  { %969 = vmatpush1.bf16.msra.mxu0 %v1557_v5  ;;  %v424_v5 = vrot.slane %v1744_v9, %v423_v3  ;;  %v1047_v44 = vrot.slane %v1037_v42, %v423_v3 }
 0x25b   :  { %970 = vmatprep.subr.bf16.mxu0 %v1562_v6  ;;  %1229 = vmatpush1.bf16.msra.mxu1 %v1611_v51  ;;  %v50_v6 = vld [vmem:[%s1816_s5] sm:$0xf] }
 0x25c   :  { %1230 = vmatprep.subr.bf16.mxu1 %v1616_v52  ;;  %v1258_v45 = vrot.slane %v50_v6, %v1759_v31  ;;  %v1262_v47 = vrot.slane %v50_v6, %v1261_v43 }
 0x25e   :  { %971 = vmatpush1.bf16.msra.mxu0 %v1560_v10  ;;  %v428_v10 = vrot.slane %v1744_v9, %v427_v4  ;;  %v1268_v51 = vrot.slane %v1258_v45, %v1759_v31 }
 0x25f   :  { %972 = vmatprep.subr.bf16.mxu0 %v1565_v11  ;;  %1231 = vmatpush1.bf16.msra.mxu1 %v1614_v53  ;;  %v434_v11 = vrot.slane %v424_v5, %v423_v3 }
 0x260   :  { %1232 = vmatprep.subr.bf16.mxu1 %v1619_v54  ;;  %v1272_v54 = vrot.slane %v1262_v47, %v1759_v31 }
 0x262   :  { %973 = vmatpush1.bf16.msra.mxu0 %v1563_v12  ;;  %v646_v12 = vrot.slane %v50_v6, %v1739_v8 }
 0x263   :  { %974 = vmatprep.subr.bf16.mxu0 %v1568_v13  ;;  %1233 = vmatpush1.bf16.msra.mxu1 %v1617_v55  ;;  %v438_v13 = vrot.slane %v428_v10, %v423_v3 }
 0x264   :  { %1234 = vmatprep.subr.bf16.mxu1 %v1622_v56 }
 0x266   :  { %975 = vmatpush1.bf16.msra.mxu0 %v1566_v14  ;;  %v650_v14 = vrot.slane %v50_v6, %v423_v3 }
 0x267   :  { %976 = vmatprep.subr.bf16.mxu0 %v1571_v15  ;;  %1235 = vmatpush1.bf16.msra.mxu1 %v1620_v57 }
 0x268   :  { %1236 = vmatprep.subr.bf16.mxu1 %v1625_v58 }
 0x26a   :  { %977 = vmatpush1.bf16.msra.mxu0 %v1569_v16 }
 0x26b   :  { %978 = vmatprep.subr.bf16.mxu0 %v1574_v17  ;;  %1237 = vmatpush1.bf16.msra.mxu1 %v1623_v59  ;;  %v656_v17 = vrot.slane %v646_v12, %v1739_v8  ;;  %v1431_v59 = vld [vmem:[%s1817_s6] ss:$0 sm:$0xff] }
 0x26c   :  { %1238 = vmatprep.subr.bf16.mxu1 %v1628_v60 }
 0x26e   :  { %979 = vmatpush1.bf16.msra.mxu0 %v1572_v18 }
 0x26f   :  { %980 = vmatprep.subr.bf16.mxu0 %v1577_v19  ;;  %1239 = vmatpush1.bf16.msra.mxu1 %v1626_v61 }
 0x270   :  { %1240 = vmatprep.subr.bf16.mxu1 %v1631_v62 }
 0x272   :  { %981 = vmatpush1.bf16.msra.mxu0 %v1575_v20  ;;  %v660_v20 = vrot.slane %v650_v14, %v1739_v8 }
 0x273   :  { %982 = vmatprep.subr.bf16.mxu0 %v1580_v22  ;;  %1241 = vmatpush1.bf16.msra.mxu1 %v1629_v63 }
 0x274   :  { %1242 = vmatprep.subr.bf16.mxu1 %v1634_v1 }
 0x276   :  { %983 = vmatpush1.bf16.msra.mxu0 %v1578_v23 }
 0x277   :  { %984 = vmatprep.subr.bf16.mxu0 %v1583_v25  ;;  %1243 = vmatpush1.bf16.msra.mxu1 %v1632_v2 }
 0x27a   :  { %985 = vmatpush1.bf16.msra.mxu0 %v1581_v26 }
 0x27b   :  { %986 = vmatprep.subr.bf16.mxu0 %v1586_v28  ;;  %v785_v28 = vrot.slane %v1772_v36, %v171_v32  ;;  %v1041_v32 = vrot.slane %v1772_v36, %v427_v4 }
 0x27d   :  { %v795_v30 = vrot.slane %v785_v28, %v1759_v31  ;;  %v1051_v46 = vrot.slane %v1041_v32, %v423_v3 }
 0x27e   :  { %987 = vmatpush1.bf16.msra.mxu0 %v1584_v29  ;;  %v791_v29 = vrot.slane %v781_v27, %v1759_v31 }
 0x281   :  { %989 = vmatmul.mubr.bf16.vlgmr.msra.gmra.mrb[8].mxu0 %v743_v0 }
 0x314   :  { %v633_v15 = vpop.f32.mrb[4].mxu0 }
 0x315   :  { %v634_v16 = vadd.f32 %v633_v15, %v434_v11  ;;  %v635_v18 = vpop.f32.mrb[5].mxu0 }
 0x316   :  { %v636_v19 = vadd.f32 %v635_v18, %v438_v13  ;;  %v637_v21 = vpop.f32.mrb[6].mxu0 }
 0x317   :  { %v640_v22 = vmax.f32 %v634_v16, 0.0  ;;  %v638_v23 = vpop.f32.mrb[7].mxu0 }
 0x318   :  { %v641_v24 = vmax.f32 %v636_v19, 0.0 }
 0x319   :  { %v661_v25 = vmul.f32 %v656_v17, %v640_v22 }
 0x31a   :  { %v662_v26 = vmul.f32 %v660_v20, %v641_v24 }
 0x31c   :  { %v663_v9 = vadd.f32 %v662_v26, %v661_v25 }
 0x31e   :  { %664 = vadd.xlane.f32.xlu0 %v663_v9 }
 0x354   :  { %v990_v8 = vpop.f32.mrb[8].mxu0 }
 0x355   :  { %v991_v0 = vadd.f32 %v990_v8, %v791_v29  ;;  %v992_v33 = vpop.f32.mrb[9].mxu0 }
 0x356   :  { %v993_v34 = vadd.f32 %v992_v33, %v795_v30  ;;  %v994_v35 = vpop.f32.mrb[10].mxu0 }
 0x357   :  { %v997_v37 = vmax.f32 %v991_v0, 0.0  ;;  %v995_v38 = vpop.f32.mrb[11].mxu0 }
 0x358   :  { %v998_v39 = vmax.f32 %v993_v34, 0.0 }
 0x359   :  { %v999_v41 = vpack.c.bf16 %v997_v37, %v997_v37 }
 0x35a   :  { %v1000_v40 = vpack.c.bf16 %v998_v39, %v998_v39 }
 0x35c   :  { %1244 = vmatprep.mubr.bf16.mxu1 %v1000_v40 }
 0x35d   :  { %1245 = vmatmul.mubr.bf16.vlgmr.msra.gmra.mrb[8].mxu1 %v999_v41 }
 0x3ab   :  { %v665_v60 = vpop.xlane.xlu0 %664 }
 0x430   :  { %v1246_v48 = vpop.f32.mrb[8].mxu1 }
 0x431   :  { %v1247_v49 = vadd.f32 %v1246_v48, %v1047_v44  ;;  %v1248_v50 = vpop.f32.mrb[9].mxu1 }
 0x432   :  { %v1249_v52 = vadd.f32 %v1248_v50, %v1051_v46  ;;  %v1250_v53 = vpop.f32.mrb[10].mxu1 }
 0x433   :  { %v1253_v55 = vmax.f32 %v1247_v49, 0.0  ;;  %v1251_v56 = vpop.f32.mrb[11].mxu1 }
 0x434   :  { %v1254_v57 = vmax.f32 %v1249_v52, 0.0 }
 0x435   :  { %v1273_v36 = vmul.f32 %v1268_v51, %v1253_v55 }
 0x436   :  { %v1274_v58 = vmul.f32 %v1272_v54, %v1254_v57 }
 0x438   :  { %v1275_v7 = vadd.f32 %v1274_v58, %v1273_v36 }
 0x43a   :  { %1276 = vadd.xlane.f32.xlu1 %v1275_v7 }
 0x4c7   :  { %v1277_v61 = vpop.xlane.xlu1 %1276 }
 0x4c8   :  { %v1279_v62 = vsel %vm1278_vm2, %v665_v60, %v1277_v61 }
 0x4c9   :  { %v1286_v63 = vadd.f32 %v1431_v59, %v1279_v62 }
 0x4cb   :  { %1288 = vst.msk [vmem:[%s1818_s7] sm:$0xff] %vm1287_vm3, %v1286_v63 }
 0x4cc   :  { %1293 = vsyncpa [#allocation3], 1 }

</bundles_post_ra>
